<compile_context>
chip_gen: v6e
topology: v6e:2x2x1
jax: 0.10.0
libtpu: 0.0.40
codegen_flags: <defaults>
</compile_context>

<pallas_src>
from functools import partial

import jax
import jax.numpy as jnp
from jax import lax
from jax.experimental import pallas as pl
from jax.experimental.pallas import tpu as pltpu


def window_encoder_kernel(nv_ref, table_t_ref, pool_t_ref, out_ref):
    # nv_ref      : (2, rows)    f32  row 0 = test-name indices (as f32 ints),
    #                                 row 1 = test values, for bw windows
    # table_t_ref : (H, V+2)     f32  fused table, transposed (resident):
    #                                 cols 0..V-1 = (E @ Wfn)^T  (name path)
    #                                 col  V      = (wv^T @ Wfv)^T (value path)
    #                                 col  V+1    = (bv @ Wfv + b_fc)^T (bias)
    # pool_t_ref  : (rows, bw)   f32  mean-pool matrix (resident):
    #                                 pool_t[r, w] = 1/n if row r is in window w
    # out_ref     : (H, bw)      f32  transposed per-window embeddings
    vp = table_t_ref.shape[1]          # V + 2 (static)
    vocab = vp - 2

    names = nv_ref[0:1, :]             # (1, rows) f32 (integer-valued)
    vals = nv_ref[1:2, :]              # (1, rows) f32

    # Single (V+2, 1) slot-id column: the only per-step constant (one vreg col).
    slot_i = lax.broadcasted_iota(jnp.int32, (vp, 1), 0)
    slot_f = slot_i.astype(jnp.float32)

    # Augmented one-hot (V+2, rows):
    #   rows 0..V-1 : one-hot of the name index      (embedding lookup)
    #   row  V      : the raw test value             (value Linear, folded)
    #   row  V+1    : 1.0                            (fused bias, folded)
    # Out-of-range names simply produce an all-zero one-hot column.
    aug = ((slot_f == names).astype(jnp.float32)
           + (slot_i == vocab).astype(jnp.float32) * vals
           + (slot_i == vocab + 1).astype(jnp.float32))            # (V+2, rows)

    # fc(name, value) for every test row, already transposed: (H, rows).
    acts = jnp.dot(table_t_ref[...], aug, preferred_element_type=jnp.float32)
    acts = jnp.maximum(acts, 0.0)                                   # ReLU

    # Mean-pool each window via a matmul; output is lane-dense (H, bw).
    out_ref[...] = jnp.dot(acts, pool_t_ref[...],
                           preferred_element_type=jnp.float32)


def prepare_params(params):
    """One-time parameter fusion (hoisted off the per-call path).

    Returns the fused, transposed table of shape (hidden, vocab + 2).
    """
    emb = params["name_embedding"]            # (V, De)
    w_v = params["value_w"]                   # (Dv, 1)  PyTorch Linear layout
    b_v = params["value_b"]                   # (Dv,)
    w_fc = params["fc_w"]                     # (H, De + Dv)
    b_fc = params["fc_b"]                     # (H,)
    de = emb.shape[1]

    wfn = w_fc[:, :de].T                      # (De, H)
    wfv = w_fc[:, de:].T                      # (Dv, H)
    table = emb @ wfn                         # (V, H)   name-embedding path
    wv = w_v.T @ wfv                          # (1, H)   value path (rank-1)
    bias = (b_v @ wfv + b_fc)[None, :]        # (1, H)   fused bias
    stacked = jnp.concatenate([table, wv, bias], axis=0)   # (V+2, H)
    return stacked.T.astype(jnp.float32)                   # (H, V+2)


@partial(jax.jit, static_argnames=("windows_per_step",))
def window_encoder_batched(test_names, test_values, table_t, *,
                           windows_per_step=128):
    """test_names/test_values: (B, N) -> (B, hidden) window embeddings."""
    b, n = test_names.shape
    hidden = table_t.shape[0]

    bw = windows_per_step
    if b <= bw:
        bw = b                                 # single grid step, full blocks
    elif bw % 128 != 0:
        raise ValueError("windows_per_step must be a multiple of 128 when "
                         "smaller than the number of windows (lane alignment).")
    b_pad = pl.cdiv(b, bw) * bw
    grid = b_pad // bw
    rows = bw * n                              # test rows per grid step

    names_f = test_names.astype(jnp.float32)
    vals_f = test_values.astype(jnp.float32)
    if b_pad != b:                             # pad with dummy windows; sliced off
        pad = b_pad - b
        names_f = jnp.concatenate([names_f, jnp.zeros((pad, n), jnp.float32)], 0)
        vals_f = jnp.concatenate([vals_f, jnp.zeros((pad, n), jnp.float32)], 0)

    # Single merged per-step input stream: row 0 = names, row 1 = values.
    nv = jnp.stack([names_f.reshape(-1), vals_f.reshape(-1)], axis=0)  # (2, b_pad*n)

    # Mean-pool matrix, built once per call and VMEM-resident across the grid.
    win_of_row = jnp.arange(rows, dtype=jnp.int32) // n
    pool_t = (win_of_row[:, None] == jnp.arange(bw, dtype=jnp.int32)[None, :]
              ).astype(jnp.float32) * (1.0 / n)                         # (rows, bw)

    out_t = pl.pallas_call(
        window_encoder_kernel,
        out_shape=jax.ShapeDtypeStruct((hidden, b_pad), jnp.float32),
        grid_spec=pltpu.PrefetchScalarGridSpec(
            num_scalar_prefetch=0,
            grid=(grid,),
            in_specs=[
                pl.BlockSpec((2, rows), lambda i: (0, i)),        # names+values chunk
                pl.BlockSpec(table_t.shape, lambda i: (0, 0)),    # fused table (resident)
                pl.BlockSpec((rows, bw), lambda i: (0, 0)),       # pool matrix (resident)
            ],
            out_specs=pl.BlockSpec((hidden, bw), lambda i: (0, i)),
        ),
        compiler_params=pltpu.CompilerParams(
            dimension_semantics=("parallel",)),
    )(nv, table_t, pool_t)

    # Transpose the small (hidden, B) slab back outside the kernel.
    return out_t[:, :b].T


def window_encoder(test_names, test_values, table_t):
    """Single-window path matching WindowEncoder.forward: (N,) -> (hidden,).

    Convenience only — use window_encoder_batched for throughput."""
    out = window_encoder_batched(test_names[None, :], test_values[None, :], table_t)
    return out[0]


def reference(test_names, test_values, params):
    """Pure-JAX reference mirroring the PyTorch forward (single window)."""
    name_embeds = params["name_embedding"][test_names]                     # (N, De)
    value_embeds = test_values[:, None] @ params["value_w"].T + params["value_b"]
    combined = jnp.concatenate([name_embeds, value_embeds], axis=-1)
    combined = jnp.maximum(combined @ params["fc_w"].T + params["fc_b"], 0.0)
    return combined.mean(axis=0)


if __name__ == "__main__":
    # Small synthetic sizes consistent with the module.
    vocab_size = 32
    name_embed_dim = 16
    value_dim = 16
    hidden_dim = 32
    num_tests = 8          # tests per window
    num_windows = 200      # windows (not a multiple of 128: exercises padding)
    windows_per_step = 128  # -> grid of 2 steps (both v7x TensorCores busy)

    key = jax.random.PRNGKey(0)
    k_emb, k_wv, k_bv, k_wfc, k_bfc, k_names, k_vals = jax.random.split(key, 7)

    params = {
        "name_embedding": jax.random.normal(
            k_emb, (vocab_size, name_embed_dim), jnp.float32),
        "value_w": jax.random.normal(k_wv, (value_dim, 1), jnp.float32) * 0.5,
        "value_b": jax.random.normal(k_bv, (value_dim,), jnp.float32) * 0.1,
        "fc_w": jax.random.normal(
            k_wfc, (hidden_dim, name_embed_dim + value_dim), jnp.float32) * 0.2,
        "fc_b": jax.random.normal(k_bfc, (hidden_dim,), jnp.float32) * 0.1,
    }

    test_names = jax.random.randint(
        k_names, (num_windows, num_tests), 0, vocab_size, jnp.int32)
    test_values = jax.random.normal(k_vals, (num_windows, num_tests), jnp.float32)

    # One-time parameter fusion (cache this; it is not on the per-call path).
    table_t = jax.block_until_ready(prepare_params(params))

    # Batched kernel: many windows per pallas_call, 128 windows per grid step.
    out = window_encoder_batched(test_names, test_values, table_t,
                                 windows_per_step=windows_per_step)
    out = jax.block_until_ready(out)

    ref = jax.vmap(reference, in_axes=(0, 0, None))(test_names, test_values, params)
    assert out.shape == (num_windows, hidden_dim)
    assert jnp.allclose(out, ref, atol=1e-4, rtol=1e-4), (out, ref)

    # Single-window path (matches the original forward signature).
    out1 = jax.block_until_ready(
        window_encoder(test_names[0], test_values[0], table_t))
    assert out1.shape == (hidden_dim,)
    assert jnp.allclose(out1, ref[0], atol=1e-4, rtol=1e-4), (out1, ref[0])

    print("KERNEL_OK")
</pallas_src>

<mosaic_0001>
module attributes {stable_mosaic.version = 11 : i64} {
  func.func @window_encoder_kernel(%arg0: i32, %arg1: memref<2x1024xf32, #tpu.memory_space<vmem>>, %arg2: memref<32x34xf32, #tpu.memory_space<vmem>>, %arg3: memref<1024x128xf32, #tpu.memory_space<vmem>>, %arg4: memref<32x128xf32, #tpu.memory_space<vmem>>) attributes {dimension_semantics = [#tpu.dimension_semantics<parallel>], iteration_bounds = array<i64: 2>, scalar_prefetch = 0 : i64, scratch_operands = 0 : i64, tpu.core_type = #tpu.core_type<tc>, window_params = [{transform_indices = @transform_0, window_bounds = array<i64: 2, 1024>}, {pipeline_mode = #tpu.pipeline_mode<synchronous>, transform_indices = @transform_1, window_bounds = array<i64: 32, 34>}, {pipeline_mode = #tpu.pipeline_mode<synchronous>, transform_indices = @transform_2, window_bounds = array<i64: 1024, 128>}, {transform_indices = @transform_3, window_bounds = array<i64: 32, 128>}]} {
    %c0 = arith.constant 0 : index
    %c0_0 = arith.constant 0 : index
    %0 = vector.load %arg1[%c0, %c0_0] : memref<2x1024xf32, #tpu.memory_space<vmem>>, vector<1x1024xf32>
    %c1 = arith.constant 1 : index
    %c0_1 = arith.constant 0 : index
    %1 = vector.load %arg1[%c1, %c0_1] : memref<2x1024xf32, #tpu.memory_space<vmem>>, vector<1x1024xf32>
    %2 = tpu.iota {dimensions = array<i32: 0>} : vector<34x1xi32>
    %3 = arith.sitofp %2 : vector<34x1xi32> to vector<34x1xf32>
    %4 = vector.broadcast %3 : vector<34x1xf32> to vector<34x1024xf32>
    %5 = vector.broadcast %0 : vector<1x1024xf32> to vector<34x1024xf32>
    %6 = arith.cmpf oeq, %4, %5 : vector<34x1024xf32>
    %7 = arith.extui %6 : vector<34x1024xi1> to vector<34x1024xi32>
    %8 = arith.sitofp %7 : vector<34x1024xi32> to vector<34x1024xf32>
    %c32_i32 = arith.constant 32 : i32
    %9 = vector.broadcast %c32_i32 : i32 to vector<34x1xi32>
    %10 = arith.cmpi eq, %2, %9 : vector<34x1xi32>
    %11 = arith.extui %10 : vector<34x1xi1> to vector<34x1xi32>
    %12 = arith.sitofp %11 : vector<34x1xi32> to vector<34x1xf32>
    %13 = vector.broadcast %12 : vector<34x1xf32> to vector<34x1024xf32>
    %14 = vector.broadcast %1 : vector<1x1024xf32> to vector<34x1024xf32>
    %15 = arith.mulf %13, %14 : vector<34x1024xf32>
    %16 = arith.addf %8, %15 : vector<34x1024xf32>
    %c33_i32 = arith.constant 33 : i32
    %17 = vector.broadcast %c33_i32 : i32 to vector<34x1xi32>
    %18 = arith.cmpi eq, %2, %17 : vector<34x1xi32>
    %19 = arith.extui %18 : vector<34x1xi1> to vector<34x1xi32>
    %20 = arith.sitofp %19 : vector<34x1xi32> to vector<34x1xf32>
    %21 = vector.broadcast %20 : vector<34x1xf32> to vector<34x1024xf32>
    %22 = arith.addf %16, %21 : vector<34x1024xf32>
    %c0_2 = arith.constant 0 : index
    %c0_3 = arith.constant 0 : index
    %23 = vector.load %arg2[%c0_2, %c0_3] : memref<32x34xf32, #tpu.memory_space<vmem>>, vector<32x34xf32>
    %cst = arith.constant dense<0.000000e+00> : vector<32x1024xf32>
    %24 = tpu.matmul %23, %22, %cst {dimension_numbers = #tpu.dot_dimension_numbers<[1], [0], [0], [1], [0, 0, 1, 1], [], []>} : vector<32x34xf32>, vector<34x1024xf32>, vector<32x1024xf32> -> vector<32x1024xf32>
    %cst_4 = arith.constant 0.000000e+00 : f32
    %25 = vector.broadcast %cst_4 : f32 to vector<32x1024xf32>
    %26 = arith.maximumf %24, %25 : vector<32x1024xf32>
    %c0_5 = arith.constant 0 : index
    %c0_6 = arith.constant 0 : index
    %27 = vector.load %arg3[%c0_5, %c0_6] : memref<1024x128xf32, #tpu.memory_space<vmem>>, vector<1024x128xf32>
    %cst_7 = arith.constant dense<0.000000e+00> : vector<32x128xf32>
    %28 = tpu.matmul %26, %27, %cst_7 {dimension_numbers = #tpu.dot_dimension_numbers<[1], [0], [0], [1], [0, 0, 1, 1], [], []>} : vector<32x1024xf32>, vector<1024x128xf32>, vector<32x128xf32> -> vector<32x128xf32>
    %c0_8 = arith.constant 0 : index
    %c0_9 = arith.constant 0 : index
    %29 = vector.load %arg4[%c0_8, %c0_9] : memref<32x128xf32, #tpu.memory_space<vmem>>, vector<32x128xf32>
    tpu.vector_store %arg4[%c0_8, %c0_9], %28 {strides = array<i32>} : memref<32x128xf32, #tpu.memory_space<vmem>>, vector<32x128xf32>,
    return
  }
  func.func @transform_0(%arg0: i32) -> (i32, i32) {
    %c0_i32 = arith.constant 0 : i32
    %c0_i32_0 = arith.constant 0 : i32
    return %c0_i32, %arg0 : i32, i32
  }
  func.func @transform_1(%arg0: i32) -> (i32, i32) {
    %c0_i32 = arith.constant 0 : i32
    %c0_i32_0 = arith.constant 0 : i32
    %c0_i32_1 = arith.constant 0 : i32
    return %c0_i32, %c0_i32_0 : i32, i32
  }
  func.func @transform_2(%arg0: i32) -> (i32, i32) {
    %c0_i32 = arith.constant 0 : i32
    %c0_i32_0 = arith.constant 0 : i32
    %c0_i32_1 = arith.constant 0 : i32
    return %c0_i32, %c0_i32_0 : i32, i32
  }
  func.func @transform_3(%arg0: i32) -> (i32, i32) {
    %c0_i32 = arith.constant 0 : i32
    %c0_i32_0 = arith.constant 0 : i32
    return %c0_i32, %arg0 : i32, i32
  }
}

</mosaic_0001>

<bundles_post_ra>
// kernel: window_encoder_batched.1
= control target key start
LH: loop header
LB: loop body
LE: loop exit
PB: predicated region body
PF: predicated region fallthrough
CT: control target
= control target key end

     0   :  { %s1864_s12 = smov 0   ;;  %s1866_s13 = smov 0   ;;  %s2665_s0 = inlined_call_operand.vmem [shape: f32[2,2048], index: 0, kind: input, shape index: {}]   ;;  %s2666_s1 = inlined_call_operand.vmem [shape: f32[32,34], index: 1, kind: input, shape index: {}]   ;;  %s2667_s2 = inlined_call_operand.vmem [shape: f32[1024,128], index: 2, kind: input, shape index: {}]   ;;  %s2668_s3 = inlined_call_operand.vmem [shape: f32[32,256], index: 3, kind: output, shape index: {}]  }
   0x1   :  { %s1868_s14 = smov 0  }
   0x2 LB: > { %s1539_s15 = sadd.s32 4294967295, %s1841_s14   ;;  %s1877_s16 = sadd.s32 1, %s1841_s14   ;;  %s1841_s14 = sphi %s1868_s14, %s2672_s14   ;;  %s1837_s13 = sphi %s1866_s13, %s2671_s13   ;;  %s1833_s12 = sphi %s1864_s12, %s2670_s12  }
   0x3   : > { %s85_s17 = ssub.s32 %s1841_s14, %s1877_s16  ;;  %s88_s18 = sadd.s32 1, %s1837_s13 }
   0x4   : > { %p86_p0 = scmp.eq.s32.totalorder %s85_s17, 0  ;;  %p98_p1 = scmp.ne.s32.totalorder %s1837_s13, %s1833_s12 }
   0x5   : > { %p99_p2 = scmp.eq.s32.totalorder %s1539_s15, 1  ;;  %p1543_p3 = scmp.ge.s32.totalorder %s1841_s14, 1 }
   0x6   : > { %s1884_s19 = scalar_select %p86_p0, %s1837_s13, %s88_s18  }
   0x7   : > { %p1886_p4 = por %p99_p2, %p98_p1  ;;  %p138_p5 = scmp.lt.s32.totalorder %s1841_s14, 3 }
   0x9   : > { %p139_p6 = pnand %p1543_p3, %p138_p5 }
   0xa   : > { %s1890_s21 = sshll.u32 (!%p139_p6), %s1539_s15, 3  ;;  %s158_s14 = sand.u32 (!%p139_p6), 1, %s1833_s12  }
   0xb   : > { %142 = sbr.rel (%p139_p6) target bundleno = 506 (0x1fa), region = 32  ;;  %p162_p7 = scmp.lt.s32.totalorder (!%p139_p6), %s1890_s21, 15 }
   0xc   : > { %s1544_s15 = sshll.u32 (!%p139_p6), %s158_s14, 5 }
   0xd   : > { %s2639_s12 = scalar_lea.vmem (!%p139_p6), [#allocation2], %s1544_s15 }
  0x10   : > { %v170_v0 = vlaneseq  ;;  %v1843_v1 = vmov 0.0   ;;  %s163_s22 = scalar_select %p162_p7, %s1890_s21, 15  ;;  %vm550_vm0 = vcmask 1041408   ;;  %vm537_vm14 = vcmask 277504  }
  0x11   : > { %639 = vmatprep.mubr.f32.mxu0 %v1843_v1  ;;  %728 = vmatprep.mubr.f32.mxu1 %v1843_v1 }
  0x12   : > { %v1895_v2 = vshrl.u32 %v170_v0, 7  ;;  %s1546_s23 = sshll.u32 %s163_s22, 1  ;;  %s1443_s22 = scalar_lea.vmem (%p1886_p4), %s2668_s3, %s1890_s21 }
  0x13   : > { %s165_s26 = scalar_lea.vmem %s2665_s0, %s1546_s23 }
  0x14   : > { %v175_v3 = vadd.s32 32, %v1895_v2  ;;  %v188_v4 = vsub.s32 1, %v1895_v2  ;;  %v196_v5 = vsub.s32 3, %v1895_v2  ;;  %v184_v6 = vsub.s32 0, %v1895_v2  ;;  %v1916_v13 = vld [vmem:[%s165_s26] ss:$2 sm:$0xff] }
  0x15   : > { %v192_v7 = vsub.s32 2, %v1895_v2  ;;  %v174_v8 = vadd.s32 24, %v1895_v2  ;;  %v173_v9 = vadd.s32 16, %v1895_v2  ;;  %v1906_v10 = vadd.s32 8, %v1895_v2  ;;  %v1918_v14 = vld [vmem:[%s165_s26 + $0x1] ss:$2 sm:$0xff] }
  0x16   : > { %v1911_v11 = vcvt.s32.f32 %v175_v3  ;;  %vm346_vm1 = vcmp.eq.s32.totalorder %v175_v3, 32  ;;  %vm482_vm2 = vcmp.eq.s32.totalorder %v175_v3, 33  ;;  %v1914_v12 = vcvt.s32.f32 %v1895_v2 }
  0x17   : > { %v1921_v15 = vsel %vm346_vm1, 1.0, %v1843_v1  ;;  %v1924_v16 = vsel %vm482_vm2, 1.0, %v1843_v1  ;;  %v1926_v17 = vcvt.s32.f32 %v174_v8  ;;  %v1928_v18 = vcvt.s32.f32 %v173_v9 }
  0x18   : > { %v1931_v19 = vrot.slane %v1916_v13, %v188_v4  ;;  %v365_v20 = vrot.slane %v1918_v14, %v188_v4  ;;  %v1935_v21 = vrot.slane %v1916_v13, %v196_v5  ;;  %v373_v22 = vrot.slane %v1918_v14, %v196_v5 }
  0x19   : > { %v1939_v23 = vrot.slane %v1916_v13, %v184_v6  ;;  %v361_v24 = vrot.slane %v1918_v14, %v184_v6  ;;  %v1943_v25 = vrot.slane %v1916_v13, %v192_v7  ;;  %v369_v26 = vrot.slane %v1918_v14, %v192_v7 }
  0x1a   : > { %vm255_vm3 = vcmp.eq.f32.partialorder %v1911_v11, %v1931_v19  ;;  %v1948_v27 = vmul.f32 0.0, %v365_v20  ;;  %v431_v28 = vmul.f32 %v1921_v15, %v365_v20  ;;  %vm257_vm4 = vcmp.eq.f32.partialorder %v1911_v11, %v1935_v21 }
  0x1b   : > { %v1581_v29 = vsel %vm255_vm3, 1.0, %v1843_v1  ;;  %v1583_v30 = vsel %vm257_vm4, 1.0, %v1843_v1  ;;  %v1955_v31 = vmul.f32 0.0, %v373_v22  ;;  %v433_v32 = vmul.f32 %v1921_v15, %v373_v22 }
  0x1c   : > { %v471_v33 = vadd.f32 %v1581_v29, %v431_v28  ;;  %vm254_vm5 = vcmp.eq.f32.partialorder %v1911_v11, %v1939_v23  ;;  %v430_v34 = vmul.f32 %v1921_v15, %v361_v24  ;;  %vm256_vm6 = vcmp.eq.f32.partialorder %v1911_v11, %v1943_v25  ;;  %v2041_v29 = vld [vmem:[%s2666_s1] sm:$0xff] }
  0x1d   : > { %v473_v35 = vadd.f32 %v1583_v30, %v433_v32  ;;  %v1580_v36 = vsel %vm254_vm5, 1.0, %v1843_v1  ;;  %v1582_v37 = vsel %vm256_vm6, 1.0, %v1843_v1  ;;  %v432_v38 = vmul.f32 %v1921_v15, %v369_v26 }
  0x1e   : > { %v526_v39 = vadd.f32 %v1924_v16, %v471_v33  ;;  %v470_v40 = vadd.f32 %v1580_v36, %v430_v34  ;;  %vm247_vm7 = vcmp.eq.f32.partialorder %v1926_v17, %v1931_v19  ;;  %vm249_vm8 = vcmp.eq.f32.partialorder %v1926_v17, %v1935_v21 }
  0x1f   : > { %v528_v41 = vadd.f32 %v1924_v16, %v473_v35  ;;  %v472_v42 = vadd.f32 %v1582_v37, %v432_v38  ;;  %v1573_v43 = vsel %vm247_vm7, 1.0, %v1843_v1  ;;  %v1575_v44 = vsel %vm249_vm8, 1.0, %v1843_v1 }
  0x20   : > { %1590 = vmatprep.subr.msk.mxu0 %vm550_vm0, %v526_v39  ;;  %v525_v45 = vadd.f32 %v1924_v16, %v470_v40  ;;  %v463_v46 = vadd.f32 %v1573_v43, %v1948_v27  ;;  %v465_v47 = vadd.f32 %v1575_v44, %v1955_v31  ;;  %vm246_vm9 = vcmp.eq.f32.partialorder %v1926_v17, %v1939_v23  ;;  %v2073_v39 = vld [vmem:[%s2666_s1 + $0x8] sm:$0xff] }
  0x21   : > { %1596 = vmatprep.subr.msk.mxu1 %vm550_vm0, %v528_v41  ;;  %v527_v48 = vadd.f32 %v1924_v16, %v472_v42  ;;  %v1572_v49 = vsel %vm246_vm9, 1.0, %v1843_v1  ;;  %v398_v50 = vmul.f32 0.0, %v361_v24  ;;  %vm248_vm10 = vcmp.eq.f32.partialorder %v1926_v17, %v1943_v25 }
  0x22   : > { %1591 = vmatpush1.msk.msra.mxu0 %vm550_vm0, %v525_v45  ;;  %v1574_v51 = vsel %vm248_vm10, 1.0, %v1843_v1  ;;  %v400_v52 = vmul.f32 0.0, %v369_v26  ;;  %vm239_vm11 = vcmp.eq.f32.partialorder %v1928_v18, %v1931_v19  ;;  %vm241_vm12 = vcmp.eq.f32.partialorder %v1928_v18, %v1935_v21 }
  0x23   : > { %1597 = vmatpush1.msk.msra.mxu1 %vm550_vm0, %v527_v48  ;;  %599 = vmatprep.subr.mxu0 %v463_v46  ;;  %v462_v53 = vadd.f32 %v1572_v49, %v398_v50  ;;  %v1565_v54 = vsel %vm239_vm11, 1.0, %v1843_v1  ;;  %v1567_v55 = vsel %vm241_vm12, 1.0, %v1843_v1  ;;  %vm238_vm13 = vcmp.eq.f32.partialorder %v1928_v18, %v1939_v23 }
  0x24   : > { %688 = vmatprep.subr.mxu1 %v465_v47  ;;  %v464_v56 = vadd.f32 %v1574_v51, %v400_v52  ;;  %v455_v57 = vadd.f32 %v1565_v54, %v1948_v27  ;;  %v457_v58 = vadd.f32 %v1567_v55, %v1955_v31  ;;  %v1564_v59 = vsel %vm238_vm13, 1.0, %v1843_v1  ;;  %v2103_v51 = vld [vmem:[%s2666_s1 + $0x10] sm:$0xff] }
  0x25   : > { %600 = vmatpush1.msra.mxu0 %v462_v53  ;;  %v454_v60 = vadd.f32 %v1564_v59, %v398_v50  ;;  %vm240_vm15 = vcmp.eq.f32.partialorder %v1928_v18, %v1943_v25  ;;  %v2002_v61 = vcvt.s32.f32 %v1906_v10  ;;  %vm223_vm1 = vcmp.eq.f32.partialorder %v1914_v12, %v1931_v19 }
  0x26   : > { %689 = vmatpush1.msra.mxu1 %v464_v56  ;;  %601 = vmatprep.subr.mxu0 %v455_v57  ;;  %v1566_v62 = vsel %vm240_vm15, 1.0, %v1843_v1  ;;  %v1549_v63 = vsel %vm223_vm1, 1.0, %v1843_v1  ;;  %vm225_vm2 = vcmp.eq.f32.partialorder %v1914_v12, %v1935_v21  ;;  %vm222_vm3 = vcmp.eq.f32.partialorder %v1914_v12, %v1939_v23 }
  0x27   : > { %690 = vmatprep.subr.mxu1 %v457_v58  ;;  %602 = vmatpush1.msra.mxu0 %v454_v60  ;;  %v456_v0 = vadd.f32 %v1566_v62, %v400_v52  ;;  %vm231_vm4 = vcmp.eq.f32.partialorder %v2002_v61, %v1931_v19  ;;  %vm233_vm5 = vcmp.eq.f32.partialorder %v2002_v61, %v1935_v21  ;;  %v1551_v3 = vsel %vm225_vm2, 1.0, %v1843_v1 }
  0x28   : > { %v1557_v4 = vsel %vm231_vm4, 1.0, %v1843_v1  ;;  %v1559_v5 = vsel %vm233_vm5, 1.0, %v1843_v1  ;;  %vm230_vm6 = vcmp.eq.f32.partialorder %v2002_v61, %v1939_v23  ;;  %vm232_vm7 = vcmp.eq.f32.partialorder %v2002_v61, %v1943_v25 }
  0x29   : > { %691 = vmatpush1.msra.mxu1 %v456_v0  ;;  %v447_v6 = vadd.f32 %v1557_v4, %v1948_v27  ;;  %v449_v7 = vadd.f32 %v1559_v5, %v1955_v31  ;;  %v1556_v8 = vsel %vm230_vm6, 1.0, %v1843_v1  ;;  %v1558_v9 = vsel %vm232_vm7, 1.0, %v1843_v1  ;;  %v2139_v4 = vld [vmem:[%s2666_s1 + $0x18] sm:$0xff] }
  0x2a   : > { %v446_v10 = vadd.f32 %v1556_v8, %v398_v50  ;;  %v448_v19 = vadd.f32 %v1558_v9, %v400_v52  ;;  %v439_v20 = vadd.f32 %v1549_v63, %v1948_v27  ;;  %v441_v21 = vadd.f32 %v1551_v3, %v1955_v31 }
  0x2b   : > { %603 = vmatprep.subr.mxu0 %v447_v6  ;;  %692 = vmatprep.subr.mxu1 %v449_v7  ;;  %v1548_v22 = vsel %vm222_vm3, 1.0, %v1843_v1  ;;  %vm224_vm8 = vcmp.eq.f32.partialorder %v1914_v12, %v1943_v25  ;;  %v204_v24 = vsub.s32 5, %v1895_v2  ;;  %v200_v26 = vsub.s32 4, %v1895_v2 }
  0x2c   : > { %604 = vmatpush1.msra.mxu0 %v446_v10  ;;  %693 = vmatpush1.msra.mxu1 %v448_v19  ;;  %v438_v28 = vadd.f32 %v1548_v22, %v398_v50  ;;  %v1550_v27 = vsel %vm224_vm8, 1.0, %v1843_v1  ;;  %v212_v23 = vsub.s32 7, %v1895_v2  ;;  %v208_v30 = vsub.s32 6, %v1895_v2 }
  0x2d   : > { %605 = vmatprep.subr.mxu0 %v439_v20  ;;  %694 = vmatprep.subr.mxu1 %v441_v21  ;;  %v440_v25 = vadd.f32 %v1550_v27, %v400_v52  ;;  %v2046_v31 = vrot.slane %v1916_v13, %v204_v24  ;;  %v381_v32 = vrot.slane %v1918_v14, %v204_v24 }
  0x2e   : > { %606 = vmatpush1.msra.mxu0 %v438_v28  ;;  %v2050_v33 = vrot.slane %v1916_v13, %v200_v26  ;;  %v377_v34 = vrot.slane %v1918_v14, %v200_v26  ;;  %v2054_v35 = vrot.slane %v1916_v13, %v212_v23  ;;  %v389_v36 = vrot.slane %v1918_v14, %v212_v23 }
  0x2f   : > { %695 = vmatpush1.msra.mxu1 %v440_v25  ;;  %1592 = vmatmul.mubr.msk.f32.vlgmr.msra.gmra.mxu0 %vm537_vm14, %v2041_v29  ;;  %vm259_vm9 = vcmp.eq.f32.partialorder %v1911_v11, %v2046_v31  ;;  %v435_v2 = vmul.f32 %v1921_v15, %v381_v32  ;;  %v2063_v37 = vrot.slane %v1916_v13, %v208_v30  ;;  %v2065_v38 = vmul.f32 0.0, %v381_v32 }
  0x30   : > { %1598 = vmatmul.mubr.msk.f32.vlgmr.msra.gmra.mxu1 %vm537_vm14, %v2041_v29  ;;  %645 = vmatprep.mubr.f32.mxu0 %v1843_v1  ;;  %v1585_v40 = vsel %vm259_vm9, 1.0, %v1843_v1  ;;  %vm258_vm10 = vcmp.eq.f32.partialorder %v1911_v11, %v2050_v33  ;;  %v434_v13 = vmul.f32 %v1921_v15, %v377_v34  ;;  %vm261_vm11 = vcmp.eq.f32.partialorder %v1911_v11, %v2054_v35 }
  0x31   : > { %734 = vmatprep.mubr.f32.mxu1 %v1843_v1  ;;  %v475_v41 = vadd.f32 %v1585_v40, %v435_v2  ;;  %v1584_v42 = vsel %vm258_vm10, 1.0, %v1843_v1  ;;  %v1587_v43 = vsel %vm261_vm11, 1.0, %v1843_v1  ;;  %v437_v44 = vmul.f32 %v1921_v15, %v389_v36  ;;  %v1009_v2 = vld [vmem:[%s2667_s2 + $0x170] sm:$0xff]  ;;  %v1008_v40 = vld [vmem:[%s2667_s2 + $0x168] sm:$0xff] }
  0x32   : > { %v474_v45 = vadd.f32 %v1584_v42, %v434_v13  ;;  %vm260_vm12 = vcmp.eq.f32.partialorder %v1911_v11, %v2063_v37  ;;  %v385_v46 = vrot.slane %v1918_v14, %v208_v30  ;;  %vm251_vm13 = vcmp.eq.f32.partialorder %v1926_v17, %v2046_v31  ;;  %v976_v13 = vld [vmem:[%s2667_s2 + $0x68] sm:$0xff]  ;;  %v991_v42 = vld [vmem:[%s2667_s2 + $0xe0] sm:$0xff] }
  0x33   : > { %1593 = vmatmul.mubr.msk.f32.gmra.mxu0 %vm537_vm14, %v2073_v39  ;;  %v530_v47 = vadd.f32 %v1924_v16, %v475_v41  ;;  %v477_v48 = vadd.f32 %v1587_v43, %v437_v44  ;;  %v1586_v49 = vsel %vm260_vm12, 1.0, %v1843_v1  ;;  %v1577_v50 = vsel %vm251_vm13, 1.0, %v1843_v1  ;;  %v1023_v41 = vld [vmem:[%s2667_s2 + $0x1e0] sm:$0xff] }
  0x34   : > { %1599 = vmatmul.mubr.msk.f32.gmra.mxu1 %vm537_vm14, %v2073_v39  ;;  %v529_v11 = vadd.f32 %v1924_v16, %v474_v45  ;;  %651 = vmatprep.mubr.f32.mxu0 %v1843_v1  ;;  %v436_v14 = vmul.f32 %v1921_v15, %v385_v46  ;;  %v467_v52 = vadd.f32 %v1577_v50, %v2065_v38  ;;  %v2106_v53 = vmul.f32 0.0, %v377_v34  ;;  %v1010_v34 = vld [vmem:[%s2667_s2 + $0x178] sm:$0xff]  ;;  %v975_v43 = vld [vmem:[%s2667_s2 + $0x60] sm:$0xff]  ;;  %v973_v50 = vld [vmem:[%s2667_s2 + $0x50] sm:$0xff] }
  0x35   : > { %1602 = vmatprep.subr.msk.mxu0 %vm550_vm0, %v530_v47  ;;  %v532_v54 = vadd.f32 %v1924_v16, %v477_v48  ;;  %740 = vmatprep.mubr.f32.mxu1 %v1843_v1  ;;  %vm250_vm15 = vcmp.eq.f32.partialorder %v1926_v17, %v2050_v33  ;;  %vm253_vm1 = vcmp.eq.f32.partialorder %v1926_v17, %v2054_v35  ;;  %v2115_v15 = vmul.f32 0.0, %v389_v36  ;;  %v993_v36 = vld [vmem:[%s2667_s2 + $0xf0] sm:$0xff]  ;;  %v1007_v44 = vld [vmem:[%s2667_s2 + $0x160] sm:$0xff]  ;;  %v1022_v45 = vld [vmem:[%s2667_s2 + $0x1d8] sm:$0xff] }
  0x36   : > { %1603 = vmatpush1.msk.msra.mxu0 %vm550_vm0, %v529_v11  ;;  %v476_v55 = vadd.f32 %v1586_v49, %v436_v14  ;;  %v1576_v56 = vsel %vm250_vm15, 1.0, %v1843_v1  ;;  %v1579_v57 = vsel %vm253_vm1, 1.0, %v1843_v1  ;;  %vm243_vm2 = vcmp.eq.f32.partialorder %v1928_v18, %v2046_v31  ;;  %v1006_v47 = vld [vmem:[%s2667_s2 + $0x158] sm:$0xff]  ;;  %v989_v48 = vld [vmem:[%s2667_s2 + $0xd0] sm:$0xff]  ;;  %v988_v14 = vld [vmem:[%s2667_s2 + $0xc8] sm:$0xff] }
  0x37   : > { %1608 = vmatprep.subr.msk.mxu1 %vm550_vm0, %v532_v54  ;;  %1594 = vmatmul.mubr.msk.f32.gmra.mxu0 %vm537_vm14, %v2103_v51  ;;  %v466_v58 = vadd.f32 %v1576_v56, %v2106_v53  ;;  %v469_v59 = vadd.f32 %v1579_v57, %v2115_v15  ;;  %v1569_v60 = vsel %vm243_vm2, 1.0, %v1843_v1  ;;  %vm252_vm3 = vcmp.eq.f32.partialorder %v1926_v17, %v2063_v37  ;;  %v1021_v49 = vld [vmem:[%s2667_s2 + $0x1d0] sm:$0xff]  ;;  %v987_v54 = vld [vmem:[%s2667_s2 + $0xc0] sm:$0xff]  ;;  %v986_v57 = vld [vmem:[%s2667_s2 + $0xb8] sm:$0xff] }
  0x38   : > { %v531_v62 = vadd.f32 %v1924_v16, %v476_v55  ;;  %1600 = vmatmul.mubr.msk.f32.gmra.mxu1 %vm537_vm14, %v2103_v51  ;;  %777 = vmatprep.subr.mxu0 %v467_v52  ;;  %v459_v63 = vadd.f32 %v1569_v60, %v2065_v38  ;;  %v1578_v0 = vsel %vm252_vm3, 1.0, %v1843_v1  ;;  %v404_v3 = vmul.f32 0.0, %v385_v46  ;;  %v974_v46 = vld [vmem:[%s2667_s2 + $0x58] sm:$0xff]  ;;  %v1005_v11 = vld [vmem:[%s2667_s2 + $0x150] sm:$0xff]  ;;  %v972_v52 = vld [vmem:[%s2667_s2 + $0x48] sm:$0xff] }
  0x39   : > { %778 = vmatpush1.msra.mxu0 %v466_v58  ;;  %657 = vmatprep.mubr.f32.mxu0 %v1843_v1  ;;  %vm242_vm4 = vcmp.eq.f32.partialorder %v1928_v18, %v2050_v33  ;;  %vm245_vm5 = vcmp.eq.f32.partialorder %v1928_v18, %v2054_v35  ;;  %vm235_vm6 = vcmp.eq.f32.partialorder %v2002_v61, %v2046_v31  ;;  %v971_v55 = vld [vmem:[%s2667_s2 + $0x40] sm:$0xff]  ;;  %v1018_v58 = vld [vmem:[%s2667_s2 + $0x1b8] sm:$0xff] }
  0x3a   : > { %1609 = vmatpush1.msk.msra.mxu1 %vm550_vm0, %v531_v62  ;;  %746 = vmatprep.mubr.f32.mxu1 %v1843_v1  ;;  %v468_v16 = vadd.f32 %v1578_v0, %v404_v3  ;;  %v1568_v17 = vsel %vm242_vm4, 1.0, %v1843_v1  ;;  %v1571_v5 = vsel %vm245_vm5, 1.0, %v1843_v1  ;;  %v1561_v6 = vsel %vm235_vm6, 1.0, %v1843_v1  ;;  %v1003_v56 = vld [vmem:[%s2667_s2 + $0x140] sm:$0xff]  ;;  %v1002_v60 = vld [vmem:[%s2667_s2 + $0x138] sm:$0xff]  ;;  %v985_v62 = vld [vmem:[%s2667_s2 + $0xb0] sm:$0xff] }
  0x3b   : > { %866 = vmatprep.subr.mxu1 %v469_v59  ;;  %779 = vmatprep.subr.mxu0 %v459_v63  ;;  %v458_v7 = vadd.f32 %v1568_v17, %v2106_v53  ;;  %v461_v8 = vadd.f32 %v1571_v5, %v2115_v15  ;;  %v451_v9 = vadd.f32 %v1561_v6, %v2065_v38  ;;  %v970_v59 = vld [vmem:[%s2667_s2 + $0x38] sm:$0xff]  ;;  %v1017_v63 = vld [vmem:[%s2667_s2 + $0x1b0] sm:$0xff]  ;;  %v968_v17 = vld [vmem:[%s2667_s2 + $0x28] sm:$0xff] }
  0x3c   : > { %867 = vmatpush1.msra.mxu1 %v468_v16  ;;  %1595 = vmatmul.mubr.msk.f32.gmra.mxu0 %vm537_vm14, %v2139_v4  ;;  %vm244_vm0 = vcmp.eq.f32.partialorder %v1928_v18, %v2063_v37  ;;  %vm234_vm7 = vcmp.eq.f32.partialorder %v2002_v61, %v2050_v33  ;;  %vm237_vm8 = vcmp.eq.f32.partialorder %v2002_v61, %v2054_v35  ;;  %v969_v0 = vld [vmem:[%s2667_s2 + $0x30] sm:$0xff]  ;;  %v1016_v16 = vld [vmem:[%s2667_s2 + $0x1a8] sm:$0xff]  ;;  %v983_v6 = vld [vmem:[%s2667_s2 + $0xa0] sm:$0xff] }
  0x3d   : > { %1601 = vmatmul.mubr.msk.f32.gmra.mxu1 %vm537_vm14, %v2139_v4  ;;  %780 = vmatpush1.msra.mxu0 %v458_v7  ;;  %v1570_v10 = vsel %vm244_vm0, 1.0, %v1843_v1  ;;  %v1560_v19 = vsel %vm234_vm7, 1.0, %v1843_v1  ;;  %v1563_v20 = vsel %vm237_vm8, 1.0, %v1843_v1  ;;  %vm227_vm9 = vcmp.eq.f32.partialorder %v1914_v12, %v2046_v31  ;;  %v1000_v5 = vld [vmem:[%s2667_s2 + $0x128] sm:$0xff]  ;;  %v1015_v7 = vld [vmem:[%s2667_s2 + $0x1a0] sm:$0xff] }
  0x3e   : > { %868 = vmatprep.subr.mxu1 %v461_v8  ;;  %781 = vmatprep.subr.mxu0 %v451_v9  ;;  %v460_v18 = vadd.f32 %v1570_v10, %v404_v3  ;;  %v450_v21 = vadd.f32 %v1560_v19, %v2106_v53  ;;  %v453_v22 = vadd.f32 %v1563_v20, %v2115_v15  ;;  %v1553_v24 = vsel %vm227_vm9, 1.0, %v1843_v1  ;;  %v967_v8 = vld [vmem:[%s2667_s2 + $0x20] sm:$0xff]  ;;  %v982_v10 = vld [vmem:[%s2667_s2 + $0x98] sm:$0xff] }
  0x3f   : > { %v443_v26 = vadd.f32 %v1553_v24, %v2065_v38  ;;  %vm236_vm10 = vcmp.eq.f32.partialorder %v2002_v61, %v2063_v37  ;;  %vm226_vm11 = vcmp.eq.f32.partialorder %v1914_v12, %v2050_v33  ;;  %817 = vmatprep.mubr.f32.mxu0 %v1843_v1  ;;  %vm229_vm12 = vcmp.eq.f32.partialorder %v1914_v12, %v2054_v35  ;;  %v994_v33 = vld [vmem:[%s2667_s2 + $0xf8] sm:$0xff]  ;;  %v992_v38 = vld [vmem:[%s2667_s2 + $0xe8] sm:$0xff]  ;;  %v999_v9 = vld [vmem:[%s2667_s2 + $0x120] sm:$0xff] }
  0x40   : > { %869 = vmatpush1.msra.mxu1 %v460_v18  ;;  %782 = vmatpush1.msra.mxu0 %v450_v21  ;;  %v1562_v28 = vsel %vm236_vm10, 1.0, %v1843_v1  ;;  %v1552_v27 = vsel %vm226_vm11, 1.0, %v1843_v1  ;;  %v1555_v23 = vsel %vm229_vm12, 1.0, %v1843_v1  ;;  %vm228_vm13 = vcmp.eq.f32.partialorder %v1914_v12, %v2063_v37  ;;  %v1026_v12 = vld [vmem:[%s2667_s2 + $0x1f8] sm:$0xff]  ;;  %v977_v37 = vld [vmem:[%s2667_s2 + $0x70] sm:$0xff] }
  0x41   : > { %870 = vmatprep.subr.mxu1 %v453_v22  ;;  %783 = vmatprep.subr.mxu0 %v443_v26  ;;  %v452_v61 = vadd.f32 %v1562_v28, %v404_v3  ;;  %v442_v30 = vadd.f32 %v1552_v27, %v2106_v53  ;;  %v445_v25 = vadd.f32 %v1555_v23, %v2115_v15  ;;  %v1554_v31 = vsel %vm228_vm13, 1.0, %v1843_v1  ;;  %v978_v35 = vld [vmem:[%s2667_s2 + $0x78] sm:$0xff]  ;;  %v1004_v53 = vld [vmem:[%s2667_s2 + $0x148] sm:$0xff]  ;;  %v1019_v15 = vld [vmem:[%s2667_s2 + $0x1c0] sm:$0xff] }
  0x42   : > { %v444_v32 = vadd.f32 %v1554_v31, %v404_v3  ;;  %906 = vmatprep.mubr.f32.mxu1 %v1843_v1  ;;  %v1001_v3 = vld [vmem:[%s2667_s2 + $0x130] sm:$0xff]  ;;  %v1014_v19 = vld [vmem:[%s2667_s2 + $0x198] sm:$0xff]  ;;  %v980_v28 = vld [vmem:[%s2667_s2 + $0x88] sm:$0xff] }
  0x43   : > { %871 = vmatpush1.msra.mxu1 %v452_v61  ;;  %784 = vmatpush1.msra.mxu0 %v442_v30  ;;  %v966_v20 = vld [vmem:[%s2667_s2 + $0x18] sm:$0xff]  ;;  %v981_v21 = vld [vmem:[%s2667_s2 + $0x90] sm:$0xff]  ;;  %v1012_v27 = vld [vmem:[%s2667_s2 + $0x188] sm:$0xff] }
  0x44   : > { %1604 = vmatmul.mubr.msk.f32.vlgmr.msra.gmra.mxu0 %vm537_vm14, %v2041_v29  ;;  %872 = vmatprep.subr.mxu1 %v445_v25  ;;  %v998_v18 = vld [vmem:[%s2667_s2 + $0x118] sm:$0xff]  ;;  %v1013_v22 = vld [vmem:[%s2667_s2 + $0x190] sm:$0xff]  ;;  %v964_v23 = vld [vmem:[%s2667_s2 + $0x8] sm:$0xff] }
  0x45   : > { %873 = vmatpush1.msra.mxu1 %v444_v32  ;;  %823 = vmatprep.mubr.f32.mxu0 %v1843_v1  ;;  %v965_v24 = vld [vmem:[%s2667_s2 + $0x10] sm:$0xff]  ;;  %v996_v61 = vld [vmem:[%s2667_s2 + $0x108] sm:$0xff]  ;;  %v979_v30 = vld [vmem:[%s2667_s2 + $0x80] sm:$0xff] }
  0x46   : > { %1610 = vmatmul.mubr.msk.f32.vlgmr.msra.gmra.mxu1 %vm537_vm14, %v2041_v29  ;;  %1618 = vmatprep.subr.mxu0 %v994_v33  ;;  %v1025_v29 = vld [vmem:[%s2667_s2 + $0x1f0] sm:$0xff]  ;;  %v1011_v25 = vld [vmem:[%s2667_s2 + $0x180] sm:$0xff]  ;;  %v1058_v33 = vld [vmem:[%s2667_s2 + $0x2f8] sm:$0xff] }
  0x47   : > { %912 = vmatprep.mubr.f32.mxu1 %v1843_v1  ;;  %1662 = vmatprep.subr.mxu1 %v1026_v12  ;;  %v997_v26 = vld [vmem:[%s2667_s2 + $0x110] sm:$0xff]  ;;  %v963_v31 = vld [vmem:[%s2667_s2] sm:$0xff]  ;;  %v1090_v12 = vld [vmem:[%s2667_s2 + $0x3f8] sm:$0xff] }
  0x48   : > { %1605 = vmatmul.mubr.msk.f32.gmra.mxu0 %vm537_vm14, %v2073_v39  ;;  %1663 = vmatpush3.msra.mxu1 %v1010_v34  ;;  %v995_v32 = vld [vmem:[%s2667_s2 + $0x100] sm:$0xff] }
  0x49   : > { %829 = vmatprep.mubr.f32.mxu0 %v1843_v1  ;;  %1619 = vmatpush3.msra.mxu0 %v978_v35 }
  0x4a   : > { %1611 = vmatmul.mubr.msk.f32.gmra.mxu1 %vm537_vm14, %v2073_v39  ;;  %1620 = vmatprep.subr.mxu0 %v993_v36  ;;  %v1024_v39 = vld [vmem:[%s2667_s2 + $0x1e8] sm:$0xff] }
  0x4b   : > { %918 = vmatprep.mubr.f32.mxu1 %v1843_v1  ;;  %1664 = vmatprep.subr.mxu1 %v1025_v29 }
  0x4c   : > { %1606 = vmatmul.mubr.msk.f32.gmra.mxu0 %vm537_vm14, %v2103_v51  ;;  %1665 = vmatpush3.msra.mxu1 %v1009_v2 }
  0x4d   : > { %835 = vmatprep.mubr.f32.mxu0 %v1843_v1  ;;  %1621 = vmatpush3.msra.mxu0 %v977_v37 }
  0x4e   : > { %1612 = vmatmul.mubr.msk.f32.gmra.mxu1 %vm537_vm14, %v2103_v51  ;;  %1622 = vmatprep.subr.mxu0 %v992_v38  ;;  %v1020_v51 = vld [vmem:[%s2667_s2 + $0x1c8] sm:$0xff] }
  0x4f   : > { %924 = vmatprep.mubr.f32.mxu1 %v1843_v1  ;;  %1666 = vmatprep.subr.mxu1 %v1024_v39  ;;  %v990_v1 = vld [vmem:[%s2667_s2 + $0xd8] sm:$0xff] }
  0x50   : > { %1607 = vmatmul.mubr.msk.f32.gmra.mxu0 %vm537_vm14, %v2139_v4  ;;  %1667 = vmatpush3.msra.mxu1 %v1008_v40  ;;  %v1042_v40 = vld [vmem:[%s2667_s2 + $0x278] sm:$0xff] }
  0x51   : > { %1623 = vmatpush3.msra.mxu0 %v976_v13  ;;  %1668 = vmatprep.subr.mxu1 %v1023_v41  ;;  %v1074_v41 = vld [vmem:[%s2667_s2 + $0x378] sm:$0xff] }
  0x52   : > { %1613 = vmatmul.mubr.msk.f32.gmra.mxu1 %vm537_vm14, %v2139_v4  ;;  %1624 = vmatprep.subr.mxu0 %v991_v42  ;;  %v984_v4 = vld [vmem:[%s2667_s2 + $0xa8] sm:$0xff]  ;;  %v1057_v42 = vld [vmem:[%s2667_s2 + $0x2f0] sm:$0xff] }
  0x53   : > { %1625 = vmatpush3.msra.mxu0 %v975_v43  ;;  %1669 = vmatpush3.msra.mxu1 %v1007_v44  ;;  %v1089_v44 = vld [vmem:[%s2667_s2 + $0x3f0] sm:$0xff] }
  0x54   : > { %1626 = vmatprep.subr.mxu0 %v990_v1  ;;  %1670 = vmatprep.subr.mxu1 %v1022_v45  ;;  %v1041_v1 = vld [vmem:[%s2667_s2 + $0x270] sm:$0xff] }
  0x55   : > { %1627 = vmatpush3.msra.mxu0 %v974_v46  ;;  %1671 = vmatpush3.msra.mxu1 %v1006_v47  ;;  %v1073_v46 = vld [vmem:[%s2667_s2 + $0x370] sm:$0xff]  ;;  %v1056_v47 = vld [vmem:[%s2667_s2 + $0x2e8] sm:$0xff] }
  0x56   : > { %1628 = vmatprep.subr.mxu0 %v989_v48  ;;  %1672 = vmatprep.subr.mxu1 %v1021_v49  ;;  %v1088_v49 = vld [vmem:[%s2667_s2 + $0x3e8] sm:$0xff] }
  0x57   : > { %1629 = vmatpush3.msra.mxu0 %v973_v50  ;;  %1673 = vmatpush3.msra.mxu1 %v1005_v11  ;;  %v1040_v50 = vld [vmem:[%s2667_s2 + $0x268] sm:$0xff] }
  0x58   : > { %1630 = vmatprep.subr.mxu0 %v988_v14  ;;  %1674 = vmatprep.subr.mxu1 %v1020_v51  ;;  %v1072_v14 = vld [vmem:[%s2667_s2 + $0x368] sm:$0xff]  ;;  %v1055_v51 = vld [vmem:[%s2667_s2 + $0x2e0] sm:$0xff] }
  0x59   : > { %1631 = vmatpush3.msra.mxu0 %v972_v52  ;;  %1675 = vmatpush3.msra.mxu1 %v1004_v53  ;;  %v1087_v53 = vld [vmem:[%s2667_s2 + $0x3e0] sm:$0xff] }
  0x5a   : > { %1632 = vmatprep.subr.mxu0 %v987_v54  ;;  %1676 = vmatprep.subr.mxu1 %v1019_v15  ;;  %v1039_v54 = vld [vmem:[%s2667_s2 + $0x260] sm:$0xff] }
  0x5b   : > { %1633 = vmatpush3.msra.mxu0 %v971_v55  ;;  %1677 = vmatpush3.msra.mxu1 %v1003_v56  ;;  %v1071_v15 = vld [vmem:[%s2667_s2 + $0x360] sm:$0xff]  ;;  %v1054_v55 = vld [vmem:[%s2667_s2 + $0x2d8] sm:$0xff] }
  0x5c   : > { %1634 = vmatprep.subr.mxu0 %v986_v57  ;;  %1678 = vmatprep.subr.mxu1 %v1018_v58  ;;  %v1086_v57 = vld [vmem:[%s2667_s2 + $0x3d8] sm:$0xff] }
  0x5d   : > { %1635 = vmatpush3.msra.mxu0 %v970_v59  ;;  %1679 = vmatpush3.msra.mxu1 %v1002_v60  ;;  %v1038_v58 = vld [vmem:[%s2667_s2 + $0x258] sm:$0xff]  ;;  %v1053_v60 = vld [vmem:[%s2667_s2 + $0x2d0] sm:$0xff] }
  0x5e   : > { %1636 = vmatprep.subr.mxu0 %v985_v62  ;;  %1680 = vmatprep.subr.mxu1 %v1017_v63  ;;  %v1070_v59 = vld [vmem:[%s2667_s2 + $0x358] sm:$0xff]  ;;  %v1085_v63 = vld [vmem:[%s2667_s2 + $0x3d0] sm:$0xff] }
  0x5f   : > { %1637 = vmatpush3.msra.mxu0 %v969_v0  ;;  %1681 = vmatpush3.msra.mxu1 %v1001_v3  ;;  %v1037_v0 = vld [vmem:[%s2667_s2 + $0x250] sm:$0xff] }
  0x60   : > { %1638 = vmatprep.subr.mxu0 %v984_v4  ;;  %1682 = vmatprep.subr.mxu1 %v1016_v16  ;;  %v1069_v3 = vld [vmem:[%s2667_s2 + $0x350] sm:$0xff]  ;;  %v1052_v4 = vld [vmem:[%s2667_s2 + $0x2c8] sm:$0xff] }
  0x61   : > { %1639 = vmatpush3.msra.mxu0 %v968_v17  ;;  %1683 = vmatpush3.msra.mxu1 %v1000_v5  ;;  %v1084_v5 = vld [vmem:[%s2667_s2 + $0x3c8] sm:$0xff] }
  0x62   : > { %1640 = vmatprep.subr.mxu0 %v983_v6  ;;  %1684 = vmatprep.subr.mxu1 %v1015_v7  ;;  %v1036_v6 = vld [vmem:[%s2667_s2 + $0x248] sm:$0xff] }
  0x63   : > { %1641 = vmatpush3.msra.mxu0 %v967_v8  ;;  %1685 = vmatpush3.msra.mxu1 %v999_v9  ;;  %v1068_v8 = vld [vmem:[%s2667_s2 + $0x348] sm:$0xff] }
  0x64   : > { %1642 = vmatprep.subr.mxu0 %v982_v10  ;;  %1686 = vmatprep.subr.mxu1 %v1014_v19  ;;  %v1051_v19 = vld [vmem:[%s2667_s2 + $0x2c0] sm:$0xff] }
  0x65   : > { %1643 = vmatpush3.msra.mxu0 %v966_v20  ;;  %1687 = vmatpush3.msra.mxu1 %v998_v18  ;;  %v1083_v18 = vld [vmem:[%s2667_s2 + $0x3c0] sm:$0xff] }
  0x66   : > { %1644 = vmatprep.subr.mxu0 %v981_v21  ;;  %1688 = vmatprep.subr.mxu1 %v1013_v22  ;;  %v1035_v22 = vld [vmem:[%s2667_s2 + $0x240] sm:$0xff] }
  0x67   : > { %1645 = vmatpush3.msra.mxu0 %v965_v24  ;;  %1689 = vmatpush3.msra.mxu1 %v997_v26  ;;  %v1067_v24 = vld [vmem:[%s2667_s2 + $0x340] sm:$0xff]  ;;  %v1050_v26 = vld [vmem:[%s2667_s2 + $0x2b8] sm:$0xff] }
  0x68   : > { %1646 = vmatprep.subr.mxu0 %v980_v28  ;;  %1690 = vmatprep.subr.mxu1 %v1012_v27 }
  0x69   : > { %1647 = vmatpush3.msra.mxu0 %v964_v23  ;;  %1691 = vmatpush3.msra.mxu1 %v996_v61  ;;  %v1082_v61 = vld [vmem:[%s2667_s2 + $0x3b8] sm:$0xff] }
  0x6a   : > { %1648 = vmatprep.subr.mxu0 %v979_v30  ;;  %1692 = vmatprep.subr.mxu1 %v1011_v25  ;;  %v1034_v30 = vld [vmem:[%s2667_s2 + $0x238] sm:$0xff] }
  0x6b   : > { %1649 = vmatpush3.msra.mxu0 %v963_v31  ;;  %1693 = vmatpush3.msra.mxu1 %v995_v32  ;;  %v1066_v31 = vld [vmem:[%s2667_s2 + $0x338] sm:$0xff] }
  0x6c   : > { %1706 = vmatprep.subr.mxu0 %v1058_v33  ;;  %1750 = vmatprep.subr.mxu1 %v1090_v12 }
  0xef   : > { %v641_v34 = vpop.f32.mrf.mxu0 }
  0xf0   : > { %v730_v35 = vpop.f32.mrf.mxu1  ;;  %v931_v38 = vmax.f32 %v641_v34, 0.0  ;;  %v1049_v34 = vld [vmem:[%s2667_s2 + $0x2b0] sm:$0xff] }
  0xf1   : > { %v643_v36 = vpop.f32.mrf.mxu0  ;;  %v933_v29 = vmax.f32 %v730_v35, 0.0 }
  0xf2   : > { %v932_v2 = vmax.f32 %v643_v36, 0.0  ;;  %v732_v37 = vpop.f32.mrf.mxu1  ;;  %v1081_v36 = vld [vmem:[%s2667_s2 + $0x3b0] sm:$0xff] }
  0xf3   : > { %v934_v39 = vmax.f32 %v732_v37, 0.0  ;;  %v2413_v13 = vpop.f32.mrf.mxu0  ;;  %v1065_v37 = vld [vmem:[%s2667_s2 + $0x330] sm:$0xff] }
  0xf4   : > { %1155 = vmatprep.mubr.f32.mxu0 %v932_v2  ;;  %v2421_v43 = vpop.f32.mrf.mxu1  ;;  %v939_v10 = vmax.f32 %v2413_v13, 0.0  ;;  %v1033_v2 = vld [vmem:[%s2667_s2 + $0x230] sm:$0xff]  ;;  %v1080_v13 = vld [vmem:[%s2667_s2 + $0x3a8] sm:$0xff] }
  0xf5   : > { %1240 = vmatprep.mubr.f32.mxu1 %v934_v39  ;;  %1156 = vmatmul.mubr.f32.vlgmr.msra.gmra.mxu0 %v931_v38  ;;  %v2429_v45 = vpop.f32.mrf.mxu0  ;;  %v941_v20 = vmax.f32 %v2421_v43, 0.0  ;;  %v1048_v38 = vld [vmem:[%s2667_s2 + $0x2a8] sm:$0xff] }
  0xf6   : > { %1241 = vmatmul.mubr.f32.vlgmr.msra.gmra.mxu1 %v933_v29  ;;  %1707 = vmatpush3.msra.mxu0 %v1042_v40  ;;  %v738_v48 = vpop.f32.mrf.mxu1  ;;  %v940_v17 = vmax.f32 %v2429_v45, 0.0  ;;  %v1047_v45 = vld [vmem:[%s2667_s2 + $0x2a0] sm:$0xff] }
  0xf7   : > { %1751 = vmatpush3.msra.mxu1 %v1074_v41  ;;  %1708 = vmatprep.subr.mxu0 %v1057_v42  ;;  %v2443_v11 = vpop.f32.mrf.mxu0  ;;  %v942_v7 = vmax.f32 %v738_v48, 0.0  ;;  %v1032_v41 = vld [vmem:[%s2667_s2 + $0x228] sm:$0xff] }
  0xf8   : > { %1752 = vmatprep.subr.mxu1 %v1089_v44  ;;  %1709 = vmatpush3.msra.mxu0 %v1041_v1  ;;  %v2451_v52 = vpop.f32.mrf.mxu1  ;;  %v947_v12 = vmax.f32 %v2443_v11, 0.0  ;;  %v1064_v44 = vld [vmem:[%s2667_s2 + $0x328] sm:$0xff]  ;;  %v1063_v11 = vld [vmem:[%s2667_s2 + $0x320] sm:$0xff] }
  0xf9   : > { %1753 = vmatpush3.msra.mxu1 %v1073_v46  ;;  %1710 = vmatprep.subr.mxu0 %v1056_v47  ;;  %v2465_v56 = vpop.f32.mrf.mxu0  ;;  %v949_v35 = vmax.f32 %v2451_v52, 0.0  ;;  %v1079_v47 = vld [vmem:[%s2667_s2 + $0x3a0] sm:$0xff]  ;;  %v1030_v52 = vld [vmem:[%s2667_s2 + $0x218] sm:$0xff] }
  0xfa   : > { %1754 = vmatprep.subr.mxu1 %v1088_v49  ;;  %1711 = vmatpush3.msra.mxu0 %v1040_v50  ;;  %v744_v62 = vpop.f32.mrf.mxu1  ;;  %v948_v23 = vmax.f32 %v2465_v56, 0.0  ;;  %v1031_v49 = vld [vmem:[%s2667_s2 + $0x220] sm:$0xff]  ;;  %v1029_v56 = vld [vmem:[%s2667_s2 + $0x210] sm:$0xff] }
  0xfb   : > { %1755 = vmatpush3.msra.mxu1 %v1072_v14  ;;  %1712 = vmatprep.subr.mxu0 %v1055_v51  ;;  %v950_v25 = vmax.f32 %v744_v62, 0.0  ;;  %v1046_v14 = vld [vmem:[%s2667_s2 + $0x298] sm:$0xff]  ;;  %v1076_v62 = vld [vmem:[%s2667_s2 + $0x388] sm:$0xff] }
  0xfc   : > { %1756 = vmatprep.subr.mxu1 %v1087_v53  ;;  %1713 = vmatpush3.msra.mxu0 %v1039_v54  ;;  %v2491_v16 = vpop.f32.mrf.mxu0  ;;  %v1078_v51 = vld [vmem:[%s2667_s2 + $0x398] sm:$0xff]  ;;  %v1045_v54 = vld [vmem:[%s2667_s2 + $0x290] sm:$0xff] }
  0xfd   : > { %1757 = vmatpush3.msra.mxu1 %v1071_v15  ;;  %1714 = vmatprep.subr.mxu0 %v1054_v55  ;;  %v2503_v9 = vpop.f32.mrf.mxu1  ;;  %v955_v1 = vmax.f32 %v2491_v16, 0.0  ;;  %v1062_v53 = vld [vmem:[%s2667_s2 + $0x318] sm:$0xff]  ;;  %v1077_v55 = vld [vmem:[%s2667_s2 + $0x390] sm:$0xff]  ;;  %v1075_v16 = vld [vmem:[%s2667_s2 + $0x380] sm:$0xff] }
  0xfe   : > { %1758 = vmatprep.subr.mxu1 %v1086_v57  ;;  %1715 = vmatpush3.msra.mxu0 %v1038_v58  ;;  %v661_v21 = vpop.f32.mrf.mxu0  ;;  %v957_v46 = vmax.f32 %v2503_v9, 0.0  ;;  %v1061_v58 = vld [vmem:[%s2667_s2 + $0x310] sm:$0xff] }
  0xff   : > { %1759 = vmatpush3.msra.mxu1 %v1070_v59  ;;  %1716 = vmatprep.subr.mxu0 %v1053_v60  ;;  %v750_v28 = vpop.f32.mrf.mxu1  ;;  %v956_v40 = vmax.f32 %v661_v21, 0.0  ;;  %v1044_v59 = vld [vmem:[%s2667_s2 + $0x288] sm:$0xff] }
 0x100   : > { %1760 = vmatprep.subr.mxu1 %v1085_v63  ;;  %1717 = vmatpush3.msra.mxu0 %v1037_v0  ;;  %v958_v43 = vmax.f32 %v750_v28, 0.0  ;;  %v1028_v63 = vld [vmem:[%s2667_s2 + $0x208] sm:$0xff] }
 0x101   : > { %1761 = vmatpush3.msra.mxu1 %v1069_v3  ;;  %1718 = vmatprep.subr.mxu0 %v1052_v4  ;;  %v1060_v0 = vld [vmem:[%s2667_s2 + $0x308] sm:$0xff]  ;;  %v1043_v4 = vld [vmem:[%s2667_s2 + $0x280] sm:$0xff] }
 0x102   : > { %1762 = vmatprep.subr.mxu1 %v1084_v5  ;;  %1719 = vmatpush3.msra.mxu0 %v1036_v6  ;;  %v1027_v6 = vld [vmem:[%s2667_s2 + $0x200] sm:$0xff] }
 0x103   : > { %1763 = vmatpush3.msra.mxu1 %v1068_v8  ;;  %1160 = vmatprep.mubr.f32.mxu0 %v940_v17 }
 0x104   : > { %1245 = vmatprep.mubr.f32.mxu1 %v942_v7  ;;  %1720 = vmatprep.subr.mxu0 %v1051_v19  ;;  %v2522_v27 = vpop.f32.mrf.mxu0  ;;  %v1059_v7 = vld [vmem:[%s2667_s2 + $0x300] sm:$0xff] }
 0x105   : > { %1764 = vmatprep.subr.mxu1 %v1083_v18  ;;  %1161 = vmatmul.mubr.f32.gmra.mxu0 %v939_v10  ;;  %v935_v10 = vmax.f32 %v2522_v27, 0.0 }
 0x106   : > { %1246 = vmatmul.mubr.f32.gmra.mxu1 %v941_v20  ;;  %1721 = vmatpush3.msra.mxu0 %v1035_v22  ;;  %v2534_v32 = vpop.f32.mrf.mxu0  ;;  %v2536_v33 = vpop.f32.mrf.mxu1 }
 0x107   : > { %1765 = vmatpush3.msra.mxu1 %v1067_v24  ;;  %1722 = vmatprep.subr.mxu0 %v1050_v26  ;;  %v936_v60 = vmax.f32 %v2534_v32, 0.0  ;;  %v937_v8 = vmax.f32 %v2536_v33, 0.0 }
 0x108   : > { %1766 = vmatprep.subr.mxu1 %v1082_v61  ;;  %1723 = vmatpush3.msra.mxu0 %v1034_v30  ;;  %v2546_v29 = vpop.f32.mrf.mxu1  ;;  %v2557_v39 = vpop.f32.mrf.mxu0 }
 0x109   : > { %1767 = vmatpush3.msra.mxu1 %v1066_v31  ;;  %1165 = vmatprep.mubr.f32.mxu0 %v948_v23  ;;  %v938_v5 = vmax.f32 %v2546_v29, 0.0  ;;  %v943_v24 = vmax.f32 %v2557_v39, 0.0 }
 0x10a   : > { %1250 = vmatprep.mubr.f32.mxu1 %v950_v25  ;;  %1724 = vmatprep.subr.mxu0 %v1049_v34  ;;  %v2565_v42 = vpop.f32.mrf.mxu1  ;;  %v827_v48 = vpop.f32.mrf.mxu0 }
 0x10b   : > { %1768 = vmatprep.subr.mxu1 %v1081_v36  ;;  %1166 = vmatmul.mubr.f32.gmra.mxu0 %v947_v12  ;;  %v944_v9 = vmax.f32 %v827_v48, 0.0  ;;  %v945_v21 = vmax.f32 %v2565_v42, 0.0 }
 0x10c   : > { %1251 = vmatmul.mubr.f32.gmra.mxu1 %v949_v35  ;;  %1725 = vmatpush3.msra.mxu0 %v1033_v2  ;;  %v916_v50 = vpop.f32.mrf.mxu1  ;;  %v831_v15 = vpop.f32.mrf.mxu0 }
 0x10d   : > { %1769 = vmatpush3.msra.mxu1 %v1065_v37  ;;  %1726 = vmatprep.subr.mxu0 %v1048_v38  ;;  %v946_v19 = vmax.f32 %v916_v50, 0.0  ;;  %v951_v30 = vmax.f32 %v831_v15, 0.0 }
 0x10e   : > { %1770 = vmatprep.subr.mxu1 %v1080_v13  ;;  %1727 = vmatpush3.msra.mxu0 %v1032_v41  ;;  %v920_v57 = vpop.f32.mrf.mxu1  ;;  %v833_v3 = vpop.f32.mrf.mxu0 }
 0x10f   : > { %1771 = vmatpush3.msra.mxu1 %v1064_v44  ;;  %1170 = vmatprep.mubr.f32.mxu0 %v956_v40  ;;  %v952_v22 = vmax.f32 %v833_v3, 0.0  ;;  %v953_v23 = vmax.f32 %v920_v57, 0.0 }
 0x110   : > { %1255 = vmatprep.mubr.f32.mxu1 %v958_v43  ;;  %1728 = vmatprep.subr.mxu0 %v1047_v45  ;;  %v922_v17 = vpop.f32.mrf.mxu1  ;;  %v837_v20 = vpop.f32.mrf.mxu0 }
 0x111   : > { %1772 = vmatprep.subr.mxu1 %v1079_v47  ;;  %1171 = vmatmul.mubr.f32.gmra.mxu0 %v955_v1  ;;  %v954_v26 = vmax.f32 %v922_v17, 0.0  ;;  %v959_v32 = vmax.f32 %v837_v20, 0.0 }
 0x112   : > { %1256 = vmatmul.mubr.f32.gmra.mxu1 %v957_v46  ;;  %1729 = vmatpush3.msra.mxu0 %v1031_v49  ;;  %v926_v18 = vpop.f32.mrf.mxu1  ;;  %v839_v28 = vpop.f32.mrf.mxu0 }
 0x113   : > { %1773 = vmatpush3.msra.mxu1 %v1063_v11  ;;  %1730 = vmatprep.subr.mxu0 %v1046_v14  ;;  %v960_v61 = vmax.f32 %v839_v28, 0.0  ;;  %v961_v31 = vmax.f32 %v926_v18, 0.0 }
 0x114   : > { %1774 = vmatprep.subr.mxu1 %v1078_v51  ;;  %1731 = vmatpush3.msra.mxu0 %v1030_v52  ;;  %v928_v27 = vpop.f32.mrf.mxu1 }
 0x115   : > { %1775 = vmatpush3.msra.mxu1 %v1062_v53  ;;  %1732 = vmatprep.subr.mxu0 %v1045_v54  ;;  %v962_v25 = vmax.f32 %v928_v27, 0.0 }
 0x116   : > { %1776 = vmatprep.subr.mxu1 %v1077_v55  ;;  %1733 = vmatpush3.msra.mxu0 %v1029_v56 }
 0x117   : > { %1777 = vmatpush3.msra.mxu1 %v1061_v58  ;;  %1734 = vmatprep.subr.mxu0 %v1044_v59 }
 0x118   : > { %1778 = vmatprep.subr.mxu1 %v1076_v62  ;;  %1735 = vmatpush3.msra.mxu0 %v1028_v63 }
 0x119   : > { %1325 = vmatprep.mubr.f32.mxu0 %v936_v60  ;;  %1779 = vmatpush3.msra.mxu1 %v1060_v0 }
 0x11a   : > { %1736 = vmatprep.subr.mxu0 %v1043_v4  ;;  %1780 = vmatprep.subr.mxu1 %v1075_v16 }
 0x11b   : > { %1737 = vmatpush3.msra.mxu0 %v1027_v6  ;;  %1781 = vmatpush3.msra.mxu1 %v1059_v7 }
 0x11c   : > { %1410 = vmatprep.mubr.f32.mxu1 %v938_v5  ;;  %1326 = vmatmul.mubr.f32.vlgmr.msra.gmra.mxu0 %v935_v10 }
 0x11d   : > { %1411 = vmatmul.mubr.f32.vlgmr.msra.gmra.mxu1 %v937_v8  ;;  %1330 = vmatprep.mubr.f32.mxu0 %v944_v9 }
 0x11e   : > { %1415 = vmatprep.mubr.f32.mxu1 %v946_v19 }
 0x120   : > { %1331 = vmatmul.mubr.f32.gmra.mxu0 %v943_v24 }
 0x121   : > { %1416 = vmatmul.mubr.f32.gmra.mxu1 %v945_v21  ;;  %1335 = vmatprep.mubr.f32.mxu0 %v952_v22 }
 0x122   : > { %1420 = vmatprep.mubr.f32.mxu1 %v954_v26 }
 0x124   : > { %1336 = vmatmul.mubr.f32.gmra.mxu0 %v951_v30 }
 0x125   : > { %1421 = vmatmul.mubr.f32.gmra.mxu1 %v953_v23  ;;  %1340 = vmatprep.mubr.f32.mxu0 %v960_v61 }
 0x126   : > { %1425 = vmatprep.mubr.f32.mxu1 %v962_v25 }
 0x128   : > { %1341 = vmatmul.mubr.f32.gmra.mxu0 %v959_v32 }
 0x129   : > { %1426 = vmatmul.mubr.f32.gmra.mxu1 %v961_v31 }
 0x1b5   : > { %v1650_v33 = vpop.f32.mrf.mxu0 }
 0x1b6   : > { %v1694_v12 = vpop.f32.mrf.mxu1 }
 0x1b7   : > { %v1651_v34 = vpop.f32.mrf.mxu0 }
 0x1b8   : > { %v1695_v35 = vpop.f32.mrf.mxu1  ;;  %v1652_v44 = vadd.f32 %v1651_v34, %v1650_v33 }
 0x1b9   : > { %v1696_v1 = vadd.f32 %v1695_v35, %v1694_v12 }
 0x1bb   : > { %v1243_v49 = vadd.f32 %v1696_v1, %v1652_v44 }
 0x1c5   : > { %v1653_v36 = vpop.f32.mrf.mxu0 }
 0x1c6   : > { %v1697_v29 = vpop.f32.mrf.mxu1 }
 0x1c7   : > { %v1654_v2 = vpop.f32.mrf.mxu0 }
 0x1c8   : > { %v1698_v37 = vpop.f32.mrf.mxu1  ;;  %v1655_v50 = vadd.f32 %v1654_v2, %v1653_v36 }
 0x1c9   : > { %v1699_v11 = vadd.f32 %v1698_v37, %v1697_v29 }
 0x1cb   : > { %v1656_v38 = vpop.f32.mrf.mxu0  ;;  %v1248_v58 = vadd.f32 %v1699_v11, %v1655_v50 }
 0x1cc   : > { %v1700_v39 = vpop.f32.mrf.mxu1 }
 0x1cd   : > { %v1657_v40 = vpop.f32.mrf.mxu0 }
 0x1ce   : > { %v1701_v13 = vpop.f32.mrf.mxu1  ;;  %v1658_v55 = vadd.f32 %v1657_v40, %v1656_v38 }
 0x1cf   : > { %v1702_v56 = vadd.f32 %v1701_v13, %v1700_v39 }
 0x1d1   : > { %v1659_v41 = vpop.f32.mrf.mxu0  ;;  %v1253_v16 = vadd.f32 %v1702_v56, %v1658_v55 }
 0x1d2   : > { %v1703_v42 = vpop.f32.mrf.mxu1 }
 0x1d3   : > { %v1660_v43 = vpop.f32.mrf.mxu0 }
 0x1d4   : > { %v1704_v45 = vpop.f32.mrf.mxu1  ;;  %v1661_v5 = vadd.f32 %v1660_v43, %v1659_v41 }
 0x1d5   : > { %v1705_v6 = vadd.f32 %v1704_v45, %v1703_v42 }
 0x1d7   : > { %v1258_v22 = vadd.f32 %v1705_v6, %v1661_v5 }
 0x1dc   : > { %v1738_v46 = vpop.f32.mrf.mxu0 }
 0x1dd   : > { %v1782_v47 = vpop.f32.mrf.mxu1 }
 0x1de   : > { %v1739_v48 = vpop.f32.mrf.mxu0 }
 0x1df   : > { %v1740_v14 = vadd.f32 %v1739_v48, %v1738_v46  ;;  %v1783_v51 = vpop.f32.mrf.mxu1 }
 0x1e0   : > { %v1741_v52 = vpop.f32.mrf.mxu0  ;;  %v1784_v54 = vadd.f32 %v1783_v51, %v1782_v47 }
 0x1e1   : > { %v1328_v53 = vadd.f32 %v1740_v14, %v1243_v49  ;;  %v1785_v15 = vpop.f32.mrf.mxu1 }
 0x1e2   : > { %v1742_v57 = vpop.f32.mrf.mxu0 }
 0x1e3   : > { %v1413_v59 = vadd.f32 %v1784_v54, %v1328_v53  ;;  %v1743_v60 = vadd.f32 %v1742_v57, %v1741_v52  ;;  %v1786_v62 = vpop.f32.mrf.mxu1 }
 0x1e4   : > { %v1744_v63 = vpop.f32.mrf.mxu0  ;;  %v1787_v3 = vadd.f32 %v1786_v62, %v1785_v15 }
 0x1e5   : > { %1431 = vst [vmem:[%s2639_s12] sm:$0xff] %v1413_v59  ;;  %v1333_v0 = vadd.f32 %v1743_v60, %v1248_v58  ;;  %v1788_v4 = vpop.f32.mrf.mxu1 }
 0x1e6   : > { %v1745_v17 = vpop.f32.mrf.mxu0 }
 0x1e7   : > { %v1418_v7 = vadd.f32 %v1787_v3, %v1333_v0  ;;  %v1746_v8 = vadd.f32 %v1745_v17, %v1744_v63  ;;  %v1789_v9 = vpop.f32.mrf.mxu1 }
 0x1e8   : > { %v1747_v10 = vpop.f32.mrf.mxu0  ;;  %v1790_v20 = vadd.f32 %v1789_v9, %v1788_v4 }
 0x1e9   : > { %1432 = vst [vmem:[%s2639_s12 + $0x8] sm:$0xff] %v1418_v7  ;;  %v1338_v19 = vadd.f32 %v1746_v8, %v1253_v16  ;;  %v1791_v18 = vpop.f32.mrf.mxu1 }
 0x1ea   : > { %v1748_v21 = vpop.f32.mrf.mxu0 }
 0x1eb   : > { %v1423_v24 = vadd.f32 %v1790_v20, %v1338_v19  ;;  %v1749_v26 = vadd.f32 %v1748_v21, %v1747_v10  ;;  %v1792_v28 = vpop.f32.mrf.mxu1 }
 0x1ec   : > { %v1793_v23 = vadd.f32 %v1792_v28, %v1791_v18  ;;  %v1478_v30 = vld [vmem:[%s2639_s12] sm:$0xff] (%p1886_p4) }
 0x1ed   : > { %1433 = vst [vmem:[%s2639_s12 + $0x10] sm:$0xff] %v1423_v24  ;;  %v1343_v27 = vadd.f32 %v1749_v26, %v1258_v22  ;;  %1441 = sbr.rel (!%p1886_p4) target bundleno = 506 (0x1fa), region = 36  ;;  %1479 = vst [vmem:[%s1443_s22] sm:$0xff] (%p1886_p4), %v1478_v30 }
 0x1ef   : > { %v1428_v61 = vadd.f32 %v1793_v23, %v1343_v27 }
 0x1f0   : > { %v1480_v25 = vld [vmem:[%s2639_s12 + $0x8] sm:$0xff] (%p1886_p4) }
 0x1f1   : > { %1434 = vst [vmem:[%s2639_s12 + $0x18] sm:$0xff] %v1428_v61  ;;  %1481 = vst [vmem:[%s1443_s22 + $0x10] sm:$0xff] (%p1886_p4), %v1480_v25 }
 0x1f4   : > { %v1482_v31 = vld [vmem:[%s2639_s12 + $0x10] sm:$0xff] }
 0x1f5   : > { %1483 = vst [vmem:[%s1443_s22 + $0x20] sm:$0xff] %v1482_v31 }
 0x1f8   : > { %v1484_v32 = vld [vmem:[%s2639_s12 + $0x18] sm:$0xff] }
 0x1f9   : > { %1485 = vst [vmem:[%s1443_s22 + $0x30] sm:$0xff] %v1484_v32 }
 0x1fa PF: > { %p10_p8 = scmp.ge.s32.totalorder %s1877_s16, 4   ;;  %s2670_s12 = smov %s1837_s13 }
 0x1fb   : > { %s2671_s13 = smov %s1884_s19  ;;  %s2672_s14 = smov %s1877_s16 }
 0x1fc   :  { %12 = sbr.rel (!%p10_p8) target bundleno = 2 (0x2), region = 101 }

</bundles_post_ra>
